<compile_context>
chip_gen: v7x
topology: tpu7x:2x2x1
jax: 0.10.0
libtpu: 0.0.40
codegen_flags: <defaults>
</compile_context>

<pallas_src>
import functools

import jax
import jax.numpy as jnp
from jax.experimental import pallas as pl
from jax.experimental.pallas import tpu as pltpu


def bilinear_matrix(out_size: int, in_size: int) -> jnp.ndarray:
    """Row-interpolation matrix reproducing torch F.interpolate bilinear,
    align_corners=False, antialias=False.  Shape: (out_size, in_size)."""
    scale = in_size / out_size
    i = jnp.arange(out_size, dtype=jnp.float32)
    src = (i + 0.5) * scale - 0.5
    src = jnp.maximum(src, 0.0)                      # PyTorch clamps src >= 0
    x0 = jnp.floor(src).astype(jnp.int32)
    x0 = jnp.minimum(x0, in_size - 1)
    x1 = jnp.minimum(x0 + 1, in_size - 1)
    l1 = src - x0.astype(jnp.float32)
    l0 = 1.0 - l1
    rows = jnp.arange(out_size)
    m = jnp.zeros((out_size, in_size), jnp.float32)
    m = m.at[rows, x0].add(l0)
    m = m.at[rows, x1].add(l1)
    return m


def _sum_sq_channels(f_ref, fo_ref, C: int, HW: int):
    """Sum over channels of (f - fo)^2, done as C lane-slices of a (nb, C*HW)
    block.  Pure VPU adds, no cross-sublane reduce, no sublane padding."""
    # TODO(synk): for very large C add a channel-chunk grid axis instead of a
    # full static unroll (compile-time / code-size growth).
    sq = None
    for c in range(C):
        d = (f_ref[:, pl.ds(c * HW, HW)].astype(jnp.float32)
             - fo_ref[:, pl.ds(c * HW, HW)].astype(jnp.float32))
        t = d * d
        sq = t if sq is None else sq + t
    return sq


def _pkd_single_kernel(f_ref, fo_ref, w_ref, num_ref, wsum_ref, *, C, HW):
    """Small-problem path: whole problem in one block, no scratch/grid."""
    w = w_ref[...].astype(jnp.float32)
    sq = _sum_sq_channels(f_ref, fo_ref, C, HW)
    num_ref[...] = jnp.sum(sq * w).reshape(1, 1)
    wsum_ref[...] = jnp.sum(w).reshape(1, 1)


def _pkd_step_kernel(f_ref, fo_ref, w_ref, num_ref, wsum_ref,
                     acc_ref, wacc_ref, *, C, HW):
    """Streaming path.  grid = (P, steps): P is a v7x TensorCore split
    ("parallel"), steps is the accumulation axis ("arbitrary")."""
    s = pl.program_id(1)

    @pl.when(s == 0)
    def _init():
        acc_ref[...] = jnp.zeros_like(acc_ref)
        wacc_ref[...] = jnp.zeros_like(wacc_ref)

    w = w_ref[...].astype(jnp.float32)                      # (nb, HW)
    sq = _sum_sq_channels(f_ref, fo_ref, C, HW)             # (nb, HW)
    # Lane-dense elementwise accumulate; cross-lane reduce deferred to epilogue.
    acc_ref[...] += sq * w
    wacc_ref[...] += w

    @pl.when(s == pl.num_programs(1) - 1)
    def _finalize():
        num_ref[...] = jnp.sum(acc_ref[...]).reshape(1, 1, 1)
        wsum_ref[...] = jnp.sum(wacc_ref[...]).reshape(1, 1, 1)


def _device_kind() -> str:
    try:
        return jax.devices()[0].device_kind.lower()
    except Exception:  # pragma: no cover
        return ""


def pkd_loss(features, features_old, pseudo_label_region):
    f5 = features[5]
    f5_old = features_old[5]
    N, C, H, W = f5.shape
    H2, W2 = features[2].shape[2], features[2].shape[3]
    # Same broadcast requirement as the PyTorch module (spatial dims match).
    assert (H2, W2) == (H, W)
    assert pseudo_label_region.shape[1] == 1

    plr = pseudo_label_region[:, 0, :, :].astype(jnp.float32)   # (N, Hp, Wp)
    Hp, Wp = plr.shape[1], plr.shape[2]

    # Hoisted bilinear resize: negligible FLOPs, done once in XLA.
    wh = bilinear_matrix(H2, Hp)                                # (H, Hp)
    ww = bilinear_matrix(W2, Wp)                                # (W, Wp)
    plr5 = jnp.einsum('hH,nHW,wW->nhw', wh, plr, ww)            # (N, H, W)

    HW = H * W
    CHW = C * HW
    # Sublane-dense 2D layouts (contiguous reshapes, free).  Features keep
    # their incoming dtype: feed bf16 from the producer to halve HBM traffic;
    # the kernel upcasts and accumulates in f32.
    f2d = f5.reshape(N, CHW)
    fo2d = f5_old.reshape(N, CHW)
    w2d = plr5.reshape(N, HW)

    feat_item = jnp.dtype(f2d.dtype).itemsize
    kind = _device_kind()
    is_v7 = "v7" in kind

    cost = pl.CostEstimate(
        flops=3 * N * CHW + 2 * N * HW,
        transcendentals=0,
        bytes_accessed=2 * N * CHW * feat_item + N * HW * 4 + 64,
    )

    # ---- tiling -----------------------------------------------------------
    # Per-generation feature-block budget: v7x has only 64 MiB physical VMEM
    # (32 MiB scoped default); v5e/v6e have 128 MiB.
    target_block_bytes = (2 << 20) if is_v7 else (4 << 20)
    per_sample_feat_bytes = CHW * feat_item
    nb_cap = max(1, target_block_bytes // per_sample_feat_bytes)

    # Small problem: single step, no scratch / init / finalize, no padding.
    if nb_cap >= N:
        num, wsum = pl.pallas_call(
            functools.partial(_pkd_single_kernel, C=C, HW=HW),
            out_shape=(jax.ShapeDtypeStruct((1, 1), jnp.float32),
                       jax.ShapeDtypeStruct((1, 1), jnp.float32)),
            cost_estimate=cost,
        )(f2d, fo2d, w2d)
        # TODO(synk): no epsilon guard on the division — matches the PyTorch
        # module, which returns inf/nan if pseudo_label_region sums to zero.
        return num[0, 0] / (wsum[0, 0] * jnp.float32(C))

    # General streaming path.
    # Batch split across TensorCores only on 2-TC parts (v7x) and only for
    # batches big enough that the padding from the split is noise.
    # TODO(synk): verify in xprof that the "parallel" axis actually shards
    # across both v7x TCs; switch to pltpu.CORE_PARALLEL / core_map if not.
    P = 2 if (is_v7 and N >= 16) else 1

    nb = min(nb_cap, -(-N // P))
    nb = max(8, (nb // 8) * 8)              # sublane-aligned block rows
    steps = -(-N // (P * nb))
    Npad = P * steps * nb
    if Npad > N:
        pad = Npad - N
        # Zero-weight (and zero-feature) padding contributes exactly 0 to both
        # the numerator and sum(w), so the loss is unchanged.
        f2d = jnp.pad(f2d, ((0, pad), (0, 0)))
        fo2d = jnp.pad(fo2d, ((0, pad), (0, 0)))
        w2d = jnp.pad(w2d, ((0, pad), (0, 0)))

    # Explicit VMEM budget covering the double-buffered inputs + scratches
    # (v5e scoped default is only 16 MiB).
    blk_f = nb * CHW * feat_item
    blk_w = nb * HW * 4
    footprint = 2 * (2 * blk_f + blk_w) + 2 * nb * HW * 4
    vmem_limit = min(max(int(footprint * 3 // 2) + (2 << 20), 32 << 20), 48 << 20)

    num_p, wsum_p = pl.pallas_call(
        functools.partial(_pkd_step_kernel, C=C, HW=HW),
        out_shape=(jax.ShapeDtypeStruct((P, 1, 1), jnp.float32),
                   jax.ShapeDtypeStruct((P, 1, 1), jnp.float32)),
        grid_spec=pltpu.PrefetchScalarGridSpec(
            num_scalar_prefetch=0,
            grid=(P, steps),
            in_specs=[
                pl.BlockSpec((nb, CHW), lambda p, s: (p * steps + s, 0)),
                pl.BlockSpec((nb, CHW), lambda p, s: (p * steps + s, 0)),
                pl.BlockSpec((nb, HW), lambda p, s: (p * steps + s, 0)),
            ],
            out_specs=[
                pl.BlockSpec((1, 1, 1), lambda p, s: (p, 0, 0)),
                pl.BlockSpec((1, 1, 1), lambda p, s: (p, 0, 0)),
            ],
            scratch_shapes=[
                pltpu.VMEM((nb, HW), jnp.float32),   # weighted-SSE partials
                pltpu.VMEM((nb, HW), jnp.float32),   # weight-sum partials
            ],
        ),
        compiler_params=pltpu.CompilerParams(
            dimension_semantics=("parallel", "arbitrary"),
            vmem_limit_bytes=vmem_limit),
        cost_estimate=cost,
    )(f2d, fo2d, w2d)

    num = jnp.sum(num_p)
    wsum = jnp.sum(wsum_p)
    # TODO(synk): no epsilon guard on the division — matches the PyTorch
    # module, which returns inf/nan if pseudo_label_region sums to zero.
    return num / (wsum * jnp.float32(C))


def pkd_loss_reference(features, features_old, pseudo_label_region):
    """Pure-JAX reference mirroring the PyTorch forward."""
    f5 = features[5]
    f5_old = features_old[5]
    H, W = features[2].shape[2], features[2].shape[3]
    plr = pseudo_label_region[:, 0, :, :]
    Hp, Wp = plr.shape[1], plr.shape[2]
    wh = bilinear_matrix(H, Hp)
    ww = bilinear_matrix(W, Wp)
    plr5 = jnp.einsum('hH,nHW,wW->nhw', wh, plr, ww)
    loss = (f5 - f5_old) ** 2
    num = jnp.sum(loss * plr5[:, None, :, :])
    den = jnp.sum(plr5) * f5.shape[1]
    return num / den


if __name__ == "__main__":
    key = jax.random.PRNGKey(0)
    k = jax.random.split(key, 8)

    N, C5, H, W = 2, 4, 16, 16     # features[5]
    C2 = 8                          # features[2] channels (only spatial used)
    Hp, Wp = 64, 64                 # pseudo_label_region spatial size

    # Build the feature pyramids (only indices 2 and 5 are consumed).
    features = [
        jax.random.normal(k[0], (N, 4, 64, 64), jnp.float32),
        jax.random.normal(k[1], (N, 4, 32, 32), jnp.float32),
        jax.random.normal(k[2], (N, C2, H, W), jnp.float32),
        jax.random.normal(k[3], (N, 4, 8, 8), jnp.float32),
        jax.random.normal(k[4], (N, 4, 8, 8), jnp.float32),
        jax.random.normal(k[5], (N, C5, H, W), jnp.float32),
    ]
    features_old = [f + 0.1 * jax.random.normal(kk, f.shape, jnp.float32)
                    for f, kk in zip(features, jax.random.split(k[6], 6))]

    pseudo_label_region = (
        jax.random.uniform(k[7], (N, 1, Hp, Wp)) > 0.5
    ).astype(jnp.float32)

    out = pkd_loss(features, features_old, pseudo_label_region)
    out = jax.block_until_ready(out)

    ref = pkd_loss_reference(features, features_old, pseudo_label_region)
    assert jnp.allclose(out, ref, rtol=1e-5, atol=1e-6), (out, ref)

    print("KERNEL_OK")
</pallas_src>

<mosaic_0001>
module attributes {stable_mosaic.version = 11 : i64} {
  func.func @_pkd_single_kernel(%arg0: memref<2x1024xf32, #tpu.memory_space<vmem>>, %arg1: memref<2x1024xf32, #tpu.memory_space<vmem>>, %arg2: memref<2x256xf32, #tpu.memory_space<vmem>>, %arg3: memref<1x1xf32, #tpu.memory_space<vmem>>, %arg4: memref<1x1xf32, #tpu.memory_space<vmem>>) attributes {dimension_semantics = [], scalar_prefetch = 0 : i64, scratch_operands = 0 : i64, tpu.core_type = #tpu.core_type<tc>} {
    %c0 = arith.constant 0 : index
    %c0_0 = arith.constant 0 : index
    %0 = vector.load %arg2[%c0, %c0_0] : memref<2x256xf32, #tpu.memory_space<vmem>>, vector<2x256xf32>
    %c0_1 = arith.constant 0 : index
    %c0_2 = arith.constant 0 : index
    %1 = vector.load %arg0[%c0_1, %c0_2] : memref<2x1024xf32, #tpu.memory_space<vmem>>, vector<2x256xf32>
    %c0_3 = arith.constant 0 : index
    %c0_4 = arith.constant 0 : index
    %2 = vector.load %arg1[%c0_3, %c0_4] : memref<2x1024xf32, #tpu.memory_space<vmem>>, vector<2x256xf32>
    %3 = arith.subf %1, %2 : vector<2x256xf32>
    %4 = arith.mulf %3, %3 : vector<2x256xf32>
    %c0_5 = arith.constant 0 : index
    %c256 = arith.constant 256 : index
    %5 = vector.load %arg0[%c0_5, %c256] : memref<2x1024xf32, #tpu.memory_space<vmem>>, vector<2x256xf32>
    %c0_6 = arith.constant 0 : index
    %c256_7 = arith.constant 256 : index
    %6 = vector.load %arg1[%c0_6, %c256_7] : memref<2x1024xf32, #tpu.memory_space<vmem>>, vector<2x256xf32>
    %7 = arith.subf %5, %6 : vector<2x256xf32>
    %8 = arith.mulf %7, %7 : vector<2x256xf32>
    %9 = arith.addf %4, %8 : vector<2x256xf32>
    %c0_8 = arith.constant 0 : index
    %c512 = arith.constant 512 : index
    %10 = vector.load %arg0[%c0_8, %c512] : memref<2x1024xf32, #tpu.memory_space<vmem>>, vector<2x256xf32>
    %c0_9 = arith.constant 0 : index
    %c512_10 = arith.constant 512 : index
    %11 = vector.load %arg1[%c0_9, %c512_10] : memref<2x1024xf32, #tpu.memory_space<vmem>>, vector<2x256xf32>
    %12 = arith.subf %10, %11 : vector<2x256xf32>
    %13 = arith.mulf %12, %12 : vector<2x256xf32>
    %14 = arith.addf %9, %13 : vector<2x256xf32>
    %c0_11 = arith.constant 0 : index
    %c768 = arith.constant 768 : index
    %15 = vector.load %arg0[%c0_11, %c768] : memref<2x1024xf32, #tpu.memory_space<vmem>>, vector<2x256xf32>
    %c0_12 = arith.constant 0 : index
    %c768_13 = arith.constant 768 : index
    %16 = vector.load %arg1[%c0_12, %c768_13] : memref<2x1024xf32, #tpu.memory_space<vmem>>, vector<2x256xf32>
    %17 = arith.subf %15, %16 : vector<2x256xf32>
    %18 = arith.mulf %17, %17 : vector<2x256xf32>
    %19 = arith.addf %14, %18 : vector<2x256xf32>
    %20 = arith.mulf %19, %0 : vector<2x256xf32>
    %21 = vector.shape_cast %20 : vector<2x256xf32> to vector<1x2x256xf32>
    %cst = arith.constant dense<0.000000e+00> : vector<1xf32>
    %22 = vector.multi_reduction <add>, %21, %cst [1, 2] : vector<1x2x256xf32> to vector<1xf32>
    %23 = vector.shape_cast %22 : vector<1xf32> to vector<1x1x1xf32>
    %24 = vector.extract %23[0, 0, 0] : f32 from vector<1x1x1xf32>
    %25 = vector.broadcast %24 : f32 to vector<1x1xf32>
    %c0_14 = arith.constant 0 : index
    %c0_15 = arith.constant 0 : index
    %26 = vector.load %arg3[%c0_14, %c0_15] : memref<1x1xf32, #tpu.memory_space<vmem>>, vector<1x1xf32>
    tpu.vector_store %arg3[%c0_14, %c0_15], %25 {strides = array<i32>} : memref<1x1xf32, #tpu.memory_space<vmem>>, vector<1x1xf32>,
    %27 = vector.shape_cast %0 : vector<2x256xf32> to vector<1x2x256xf32>
    %cst_16 = arith.constant dense<0.000000e+00> : vector<1xf32>
    %28 = vector.multi_reduction <add>, %27, %cst_16 [1, 2] : vector<1x2x256xf32> to vector<1xf32>
    %29 = vector.shape_cast %28 : vector<1xf32> to vector<1x1x1xf32>
    %30 = vector.extract %29[0, 0, 0] : f32 from vector<1x1x1xf32>
    %31 = vector.broadcast %30 : f32 to vector<1x1xf32>
    %c0_17 = arith.constant 0 : index
    %c0_18 = arith.constant 0 : index
    %32 = vector.load %arg4[%c0_17, %c0_18] : memref<1x1xf32, #tpu.memory_space<vmem>>, vector<1x1xf32>
    tpu.vector_store %arg4[%c0_17, %c0_18], %31 {strides = array<i32>} : memref<1x1xf32, #tpu.memory_space<vmem>>, vector<1x1xf32>,
    return
  }
}

</mosaic_0001>

<bundles_post_ra>
// kernel: tpu_custom_call.1
= control target key start
LH: loop header
LB: loop body
LE: loop exit
PB: predicated region body
PF: predicated region fallthrough
CT: control target
= control target key end

     0   :  { %10 = vsyncpa [#allocation3], 0  ;;  %s333_s0 = inlined_call_operand.hbm [shape: f32[2,1024], index: 0, kind: input, shape index: {}]   ;;  %s334_s1 = inlined_call_operand.hbm [shape: f32[2,1024], index: 1, kind: input, shape index: {}]   ;;  %s335_s2 = inlined_call_operand.vmem [shape: f32[2,256], index: 2, kind: input, shape index: {}]   ;;  %s336_s3 = inlined_call_operand.hbm [shape: f32[1,1], index: 3, kind: output, shape index: {0}]   ;;  %s337_s4 = inlined_call_operand.hbm [shape: f32[1,1], index: 4, kind: output, shape index: {1}]  }
   0x1   :  { %11 = vsyncpa [#allocation6], 0 }
   0x2   :  { %12 = vsyncpa [#allocation4], 0 }
   0x3   :  { %13 = vsyncpa [#allocation9], 0  ;;  %s250_s15 = smov [#allocation2]   ;;  %s251_s17 = smov [#allocation5]  }
   0x4   :  { %s20_s16 = sshll.u32 %s250_s15, 4  ;;  %s30_s18 = sshll.u32 %s251_s17, 4  ;;  %s21_s16 = int_to_ptr.vmem [resolvable:$true] %s20_s16  ;;  %s31_s18 = int_to_ptr.vmem [resolvable:$true] %s30_s18 }
   0x5   :  { %s154_s21 = scalar_lea.hbm %s333_s0, 256 }
   0x6   :  { %p155_p0 = scmp.ne.s32.totalorder %s333_s0, %s154_s21  ;;  %p158_p1 = scmp.lt.u32.totalorder %s154_s21, %s333_s0 }
   0x8   :  { %p160_p2 = pnand %p158_p1, %p155_p0 }
   0xa   :  { %163 = shalt.err (!%p160_p2)
}
   0xb   :  { %s164_s26 = scalar_lea.vmem %s21_s16, 256  ;;  %p169_p4 = scmp.lt.s32.totalorder %s21_s16, %s21_s16 }
   0xc   :  { %p165_p3 = scmp.ne.s32.totalorder %s21_s16, %s164_s26  ;;  %p170_p5 = scmp.lt.s32.totalorder %s164_s26, %s164_s26 }
   0xe   :  { %p171_p6 = por %p170_p5, %p169_p4 }
  0x10   :  { %p172_p7 = pnand %p171_p6, %p165_p3 }
  0x12   :  { %175 = shalt.err (!%p172_p7)
}
  0x13   :  { %23 = dma.hbm_to_vmem [thread:$0]  %s333_s0, 256, %s21_s16, [#allocation3]  }
  0x14   :  { %s176_s5 = scalar_lea.hbm %s334_s1, 256 }
  0x15   :  { %p177_p8 = scmp.ne.s32.totalorder %s334_s1, %s176_s5  ;;  %p180_p9 = scmp.lt.u32.totalorder %s176_s5, %s334_s1 }
  0x17   :  { %p182_p10 = pnand %p180_p9, %p177_p8 }
  0x19   :  { %185 = shalt.err (!%p182_p10)
}
  0x1a   :  { %s186_s10 = scalar_lea.vmem %s31_s18, 256  ;;  %p191_p12 = scmp.lt.s32.totalorder %s31_s18, %s31_s18 }
  0x1b   :  { %p187_p11 = scmp.ne.s32.totalorder %s31_s18, %s186_s10  ;;  %p192_p13 = scmp.lt.s32.totalorder %s186_s10, %s186_s10 }
  0x1d   :  { %p193_p0 = por %p192_p13, %p191_p12 }
  0x1f   :  { %p194_p1 = pnand %p193_p0, %p187_p11 }
  0x21   :  { %197 = shalt.err (!%p194_p1)
}
  0x22   :  { %33 = dma.hbm_to_vmem [thread:$0]  %s334_s1, 256, %s31_s18, [#allocation6]  }
  0x23   :  { %242 = dma.done.wait [#allocation3], 256  }
  0x24   :  { %243 = vsyncadd [#allocation3], 4294967040 }
  0x25   :  { %244 = dma.done.wait [#allocation6], 256  }
  0x26   :  { %245 = vsyncadd [#allocation6], 4294967040  ;;  %v43_v0 = vld [vmem:[#allocation2] sm:$0xf]  ;;  %v44_v1 = vld [vmem:[#allocation5] sm:$0xf]  ;;  %v67_v4 = vlaneseq }
  0x27   :  { %v252_v2 = vmov 1983009808   ;;  %v45_v5 = vsub.f32 %v43_v0, %v44_v1  ;;  %v47_v6 = vld [vmem:[#allocation2 + $0x4] sm:$0xf]  ;;  %v48_v7 = vld [vmem:[#allocation5 + $0x4] sm:$0xf] }
  0x28   :  { %v65_v3 = vunpack.c.l.s4 %v252_v2  ;;  %v52_v8 = vld [vmem:[#allocation2 + $0x8] sm:$0xf]  ;;  %v49_v9 = vsub.f32 %v47_v6, %v48_v7  ;;  %v53_v10 = vld [vmem:[#allocation5 + $0x8] sm:$0xf]  ;;  %v57_v11 = vld [vmem:[#allocation2 + $0xc] sm:$0xf] }
  0x29   :  { %v58_v12 = vld [vmem:[#allocation5 + $0xc] sm:$0xf]  ;;  %v46_v13 = vmul.f32 %v45_v5, %v45_v5  ;;  %v54_v14 = vsub.f32 %v52_v8, %v53_v10  ;;  %v68_v18 = vshrl.u32 %v67_v4, 7  ;;  %v42_v24 = vld [vmem:[%s335_s2] sm:$0xf]  ;;  %vm74_vm0 = vcmask 1041408  }
  0x2a   :  { %v59_v15 = vsub.f32 %v57_v11, %v58_v12  ;;  %v50_v16 = vmul.f32 %v49_v9, %v49_v9  ;;  %v66_v17 = vunpack.c.0.s8 %v65_v3  ;;  %s253_s2 = smov [#allocation7]   ;;  %vm88_vm1 = vcmask 0   ;;  %s254_s15 = smov [#allocation8]  }
  0x2b   :  { %v55_v19 = vmul.f32 %v54_v14, %v54_v14  ;;  %s121_s13 = sshll.u32 %s253_s2, 4  ;;  %s131_s16 = sshll.u32 %s254_s15, 4  ;;  %s122_s13 = int_to_ptr.vmem [resolvable:$true] %s121_s13  ;;  %s132_s16 = int_to_ptr.vmem [resolvable:$true] %s131_s16 }
  0x2c   :  { %v51_v20 = vadd.f32 %v50_v16, %v46_v13  ;;  %v60_v21 = vmul.f32 %v59_v15, %v59_v15  ;;  %v69_v23 = vsub.s32 %v66_v17, %v68_v18  ;;  %s198_s17 = scalar_lea.vmem %s122_s13, 16  ;;  %s202_s18 = scalar_lea.vmem %s122_s13, 32 }
  0x2d   :  { %p199_p2 = scmp.ne.s32.totalorder %s122_s13, %s198_s17  ;;  %p203_p3 = scmp.lt.s32.totalorder %s122_s13, %s122_s13 }
  0x2e   :  { %v56_v22 = vadd.f32 %v55_v19, %v51_v20  ;;  %v97_v26 = vrot.slane %v42_v24, %v69_v23  ;;  %p204_p4 = scmp.lt.s32.totalorder %s202_s18, %s198_s17 }
  0x30   :  { %v61_v25 = vadd.f32 %v60_v21, %v56_v22  ;;  %v98_v29 = vcombine.high %v97_v26, %v97_v26  ;;  %v101_v33 = vsel %vm74_vm0, %v97_v26, 0.0  ;;  %p205_p5 = por %p204_p4, %p203_p3 }
  0x32   :  { %v62_v27 = vmul.f32 %v61_v25, %v42_v24  ;;  %v102_v34 = vsel %vm74_vm0, %v98_v29, 0.0  ;;  %p206_p6 = pnand %p205_p5, %p199_p2 }
  0x33   :  { %v103_v36 = vadd.f32 %v102_v34, %v101_v33 }
  0x34   :  { %v70_v28 = vrot.slane %v62_v27, %v69_v23 }
  0x36   :  { %v71_v30 = vcombine.high %v70_v28, %v70_v28  ;;  %v75_v31 = vsel %vm74_vm0, %v70_v28, 0.0 }
  0x38   :  { %v76_v32 = vsel %vm74_vm0, %v71_v30, 0.0 }
  0x39   :  { %v77_v35 = vadd.f32 %v76_v32, %v75_v31 }
  0x3b   :  { %78 = vadd.xlane.f32.xlu0 %v77_v35 }
  0x3f   :  { %104 = vadd.xlane.f32.xlu0 %v103_v36 }
  0xc8   :  { %v79_v37 = vpop.xlane.xlu0 %78 }
  0xc9   :  { %v80_v38 = vrot.slane %v79_v37, 4 }
  0xcb   :  { %v81_v39 = vadd.f32 %v80_v38, %v79_v37 }
  0xcc   :  { %v105_v40 = vpop.xlane.xlu0 %104 }
  0xcd   :  { %v82_v41 = vrot.slane %v81_v39, 2  ;;  %v106_v42 = vrot.slane %v105_v40, 4 }
  0xcf   :  { %v107_v43 = vadd.f32 %v106_v42, %v105_v40  ;;  %v83_v44 = vadd.f32 %v82_v41, %v81_v39 }
  0xd1   :  { %v108_v45 = vrot.slane %v107_v43, 2  ;;  %v84_v46 = vrot.slane %v83_v44, 1 }
  0xd3   :  { %v109_v47 = vadd.f32 %v108_v45, %v107_v43  ;;  %v85_v48 = vadd.f32 %v84_v46, %v83_v44 }
  0xd5   :  { %145 = vpush %v85_v48  ;;  %v110_v49 = vrot.slane %v109_v47, 1 }
  0xd7   :  { %v111_v50 = vadd.f32 %v110_v49, %v109_v47 }
  0xd9   :  { %147 = vpush %v111_v50 }
 0x106   :  { %s146_s14 = spop %145 }
 0x107   :  { %v87_v51 = vstv %s146_s14 }
 0x108   :  { %89 = vst.msk [vmem:[#allocation7] sm:$0x1] %vm88_vm1, %v87_v51 }
 0x109   :  { %209 = shalt.err (!%p206_p6)
}
 0x10a   :  { %s210_s21 = scalar_lea.hbm %s336_s3, 16 }
 0x10b   :  { %p211_p7 = scmp.ne.s32.totalorder %s336_s3, %s210_s21  ;;  %p214_p8 = scmp.lt.u32.totalorder %s210_s21, %s336_s3 }
 0x10d   :  { %p216_p9 = pnand %p214_p8, %p211_p7 }
 0x10f   :  { %219 = shalt.err (!%p216_p9)
}
 0x110   :  { %124 = dma.vmem_to_hbm [thread:$0]  %s122_s13, 16, %s336_s3, [#allocation4]  }
 0x111   :  { %s148_s28 = spop %147  ;;  %s220_s29 = scalar_lea.vmem %s132_s16, 16 }
 0x112   :  { %v113_v52 = vstv %s148_s28  ;;  %p221_p10 = scmp.ne.s32.totalorder %s132_s16, %s220_s29  ;;  %s224_s30 = scalar_lea.vmem %s132_s16, 32 }
 0x113   :  { %114 = vst.msk [vmem:[#allocation8] sm:$0x1] %vm88_vm1, %v113_v52  ;;  %p225_p11 = scmp.lt.s32.totalorder %s132_s16, %s132_s16  ;;  %p226_p12 = scmp.lt.s32.totalorder %s224_s30, %s220_s29 }
 0x115   :  { %p227_p13 = por %p226_p12, %p225_p11 }
 0x117   :  { %p228_p0 = pnand %p227_p13, %p221_p10 }
 0x119   :  { %231 = shalt.err (!%p228_p0)
}
 0x11a   :  { %s232_s7 = scalar_lea.hbm %s337_s4, 16 }
 0x11b   :  { %p233_p1 = scmp.ne.s32.totalorder %s337_s4, %s232_s7  ;;  %p236_p2 = scmp.lt.u32.totalorder %s232_s7, %s337_s4 }
 0x11d   :  { %p238_p3 = pnand %p236_p2, %p233_p1 }
 0x11f   :  { %241 = shalt.err (!%p238_p3)
}
 0x120   :  { %134 = dma.vmem_to_hbm [thread:$0]  %s132_s16, 16, %s337_s4, [#allocation9]  }
 0x121   :  { %246 = dma.done.wait [#allocation4], 16  }
 0x122   :  { %247 = vsyncadd [#allocation4], 4294967280 }
 0x123   :  { %248 = dma.done.wait [#allocation9], 16  }
 0x124   :  { %249 = vsyncadd [#allocation9], 4294967280 }
 0x125   :  { %141 = vsyncpa [#allocation3], 1 }
 0x126   :  { %142 = vsyncpa [#allocation6], 1 }
 0x127   :  { %143 = vsyncpa [#allocation4], 1 }
 0x128   :  { %144 = vsyncpa [#allocation9], 1 }

</bundles_post_ra>
